<compile_context>
chip_gen: v7x
topology: tpu7x:2x2x1
jax: 0.10.0
libtpu: 0.0.40
codegen_flags: <defaults>
</compile_context>

<pallas_src>
import functools

import jax
import jax.numpy as jnp
from jax.experimental import pallas as pl
from jax.experimental.pallas import tpu as pltpu


def _vmem_capacity_bytes() -> int:
    """Physical VMEM per TensorCore; conservative fallback = v7x (64 MiB)."""
    try:
        info = pltpu.get_tpu_info()
        cap = getattr(info, "vmem_capacity_bytes", None)
        if cap:
            return int(cap)
    except Exception:
        pass
    return 64 * 1024 * 1024


# --------------------------------------------------------------------------
# Strategy A: whole table resident in VMEM (single-buffered scratch),
# per-row dynamic-slice gather into the pipelined output block.
# --------------------------------------------------------------------------
def _gather_vmem_kernel(idx_ref, data_hbm, out_ref, table, load_sem, *, tb):
    i = pl.program_id(0)

    @pl.when(i == 0)
    def _load_table():
        cp = pltpu.make_async_copy(data_hbm, table, load_sem)
        cp.start()
        cp.wait()

    base = i * tb

    @pl.loop(0, tb)
    def _gather(t):
        r = idx_ref[base + t]                                  # SMEM scalar
        out_ref[pl.ds(t, 1), :] = table[pl.ds(r, 1), :].astype(out_ref.dtype)


# --------------------------------------------------------------------------
# Strategy B: table stays in HBM; double-buffered row-DMA gather.
#   - step i issues step i+1's TB row copies into slot (i+1)%2
#   - then waits (matched per-row waits) on slot i%2 and stores the block.
# --------------------------------------------------------------------------
def _gather_hbm_kernel(idx_ref, data_hbm, out_ref, row_buf, sems, *, tb):
    i = pl.program_id(0)
    nsteps = pl.num_programs(0)

    def issue(step, slot):
        base = step * tb

        @pl.loop(0, tb)
        def _issue(t):
            r = idx_ref[base + t]
            pltpu.make_async_copy(
                data_hbm.at[pl.ds(r, 1)],            # (1, D) HBM row
                row_buf.at[slot, pl.ds(t, 1)],       # (1, D) VMEM slot row
                sems.at[slot],
            ).start()

    @pl.when(i == 0)
    def _prologue():
        issue(0, 0)

    @pl.when(i + 1 < nsteps)
    def _prefetch_next():
        issue(i + 1, (i + 1) % 2)

    slot = i % 2

    @pl.loop(0, tb)
    def _wait(t):
        # Matched wait per started copy (same dst shape + same semaphore).
        pltpu.make_async_copy(
            data_hbm.at[pl.ds(0, 1)],
            row_buf.at[slot, pl.ds(t, 1)],
            sems.at[slot],
        ).wait()

    out_ref[...] = row_buf[slot].astype(out_ref.dtype)


# --------------------------------------------------------------------------
# Wrapper
# --------------------------------------------------------------------------
def net_forward(dataset: jax.Array, indices: jax.Array,
                strategy: str | None = None) -> jax.Array:
    """float32 dataset[indices] (== torch.FloatTensor(dataset[indices]))."""
    dataset = jnp.asarray(dataset)
    indices = jnp.asarray(indices)
    n, d = dataset.shape
    (b,) = indices.shape
    itemsize = dataset.dtype.itemsize

    # Generation-aware VMEM budget (v5e/v6e: 128 MiB phys -> ~96 MiB limit;
    # v7x: 64 MiB phys -> ~48 MiB limit).
    vmem_cap = _vmem_capacity_bytes()
    vmem_limit = int(min(vmem_cap * 3 // 4, 100 * 1024 * 1024))

    # Rows per grid step: target ~1 MiB f32 output block, multiple of 8.
    target_block_bytes = 1 * 1024 * 1024
    tb = target_block_bytes // (d * 4)
    tb = max(8, min(tb, 1024, ((b + 7) // 8) * 8))
    tb = (tb // 8) * 8

    b_pad = ((b + tb - 1) // tb) * tb
    grid = (b_pad // tb,)

    # PyTorch-style negative indexing; clamp as an OOB guard (PyTorch raises).
    idx = indices.astype(jnp.int32)
    idx = jnp.where(idx < 0, idx + n, idx)
    idx = jnp.clip(idx, 0, n - 1)
    if b_pad != b:
        idx = jnp.pad(idx, (0, b_pad - b))            # pad with row 0

    # Resident working-set estimate (account for internal tile padding).
    d_lanes = ((d + 127) // 128) * 128
    sub = max(8, 32 // itemsize)
    n_rows_pad = ((n + sub - 1) // sub) * sub
    table_bytes = n_rows_pad * d_lanes * itemsize                 # 1 buffer
    out_block_bytes = 2 * tb * d_lanes * 4                        # dbl-buffered out
    resident_ws = table_bytes + out_block_bytes + (1 << 20)       # + headroom

    if strategy is None:
        strategy = "vmem" if resident_ws <= int(vmem_limit * 0.85) else "hbm"
    assert strategy in ("vmem", "hbm")

    out_shape = jax.ShapeDtypeStruct((b_pad, d), jnp.float32)
    out_spec = pl.BlockSpec((tb, d), lambda i, idx_ref: (i, 0))
    compiler_params = pltpu.CompilerParams(
        dimension_semantics=("arbitrary",),   # scratch/prefetch state carries
        vmem_limit_bytes=vmem_limit,
    )

    if strategy == "vmem":
        grid_spec = pltpu.PrefetchScalarGridSpec(
            num_scalar_prefetch=1,
            grid=grid,
            in_specs=[pl.BlockSpec(memory_space=pl.ANY)],   # table stays in HBM;
            out_specs=out_spec,                              # copied once below
            scratch_shapes=[
                pltpu.VMEM((n, d), dataset.dtype),           # single-buffered table
                pltpu.SemaphoreType.DMA(()),
            ],
        )
        kernel = functools.partial(_gather_vmem_kernel, tb=tb)
    else:
        grid_spec = pltpu.PrefetchScalarGridSpec(
            num_scalar_prefetch=1,
            grid=grid,
            in_specs=[pl.BlockSpec(memory_space=pl.ANY)],
            out_specs=out_spec,
            scratch_shapes=[
                pltpu.VMEM((2, tb, d), dataset.dtype),       # double-buffered rows
                pltpu.SemaphoreType.DMA((2,)),               # per-slot semaphores
            ],
        )
        kernel = functools.partial(_gather_hbm_kernel, tb=tb)

    out = pl.pallas_call(
        kernel,
        grid_spec=grid_spec,
        out_shape=out_shape,
        compiler_params=compiler_params,
    )(idx, dataset)

    return out if b_pad == b else out[:b]


if __name__ == "__main__":
    key = jax.random.PRNGKey(0)
    k_data, k_idx = jax.random.split(key)

    N, D, B = 64, 128, 300
    dataset = jax.random.normal(k_data, (N, D), dtype=jnp.float32)
    indices = jax.random.randint(k_idx, (B,), 0, N, dtype=jnp.int32)

    ref = dataset[indices].astype(jnp.float32)

    # Auto dispatch: 32 KiB table -> VMEM-resident gather.
    out_vmem = jax.block_until_ready(net_forward(dataset, indices))
    assert out_vmem.shape == (B, D) and out_vmem.dtype == jnp.float32
    assert jnp.array_equal(out_vmem, ref), "VMEM-resident gather mismatch"

    # Also exercise the large-dataset path (HBM + double-buffered row DMAs).
    out_hbm = jax.block_until_ready(net_forward(dataset, indices, strategy="hbm"))
    assert out_hbm.shape == (B, D) and out_hbm.dtype == jnp.float32
    assert jnp.array_equal(out_hbm, ref), "HBM-gather mismatch"

    print("KERNEL_OK")
</pallas_src>

<mosaic_0001>
module attributes {stable_mosaic.version = 11 : i64} {
  func.func @_gather_vmem_kernel(%arg0: i32, %arg1: memref<304xi32, #tpu.memory_space<smem>>, %arg2: memref<64x128xf32, #tpu.memory_space<any>>, %arg3: memref<304x128xf32, #tpu.memory_space<vmem>>, %arg4: memref<64x128xf32, #tpu.memory_space<vmem>>, %arg5: memref<!tpu.dma_semaphore, #tpu.memory_space<semaphore_mem>>) attributes {dimension_semantics = [#tpu.dimension_semantics<arbitrary>], iteration_bounds = array<i64: 1>, scalar_prefetch = 1 : i64, scratch_operands = 2 : i64, tpu.core_type = #tpu.core_type<tc>, window_params = [{}, {transform_indices = @transform_1, window_bounds = array<i64: 304, 128>}]} {
    %c0_i32 = arith.constant 0 : i32
    %0 = arith.cmpi eq, %arg0, %c0_i32 : i32
    %1 = arith.extui %0 : i1 to i32
    %c0_i32_0 = arith.constant 0 : i32
    %2 = arith.cmpi ne, %1, %c0_i32_0 : i32
    scf.if %2 {
      tpu.enqueue_dma source(%arg2 : memref<64x128xf32, #tpu.memory_space<any>>) target(%arg4 : memref<64x128xf32, #tpu.memory_space<vmem>>) target_semaphore(%arg5 : memref<!tpu.dma_semaphore, #tpu.memory_space<semaphore_mem>>)
      tpu.wait_dma2 semaphore(%arg5 : memref<!tpu.dma_semaphore, #tpu.memory_space<semaphore_mem>>) src(%arg2 : memref<64x128xf32, #tpu.memory_space<any>>) dst(%arg4 : memref<64x128xf32, #tpu.memory_space<vmem>>)
    } else {
    }
    %c304_i32 = arith.constant 304 : i32
    %3 = arith.muli %arg0, %c304_i32 : i32
    %c0_i32_1 = arith.constant 0 : i32
    %c304_i32_2 = arith.constant 304 : i32
    %4 = arith.addi %c0_i32_1, %c304_i32_2 : i32
    %c1_i32 = arith.constant 1 : i32
    scf.for %arg6 = %c0_i32_1 to %4 step %c1_i32  : i32 {
      %c1_i32_4 = arith.constant 1 : i32
      %5 = arith.muli %arg6, %c1_i32_4 : i32
      %c0_i32_5 = arith.constant 0 : i32
      %6 = arith.addi %c0_i32_5, %5 : i32
      %7 = arith.addi %3, %6 : i32
      %8 = arith.index_cast %7 : i32 to index
      %9 = memref.load %arg1[%8] : memref<304xi32, #tpu.memory_space<smem>>
      %10 = arith.index_cast %9 : i32 to index
      %c0 = arith.constant 0 : index
      %11 = vector.load %arg4[%10, %c0] : memref<64x128xf32, #tpu.memory_space<vmem>>, vector<1x128xf32>
      %12 = arith.index_cast %6 : i32 to index
      %c0_6 = arith.constant 0 : index
      %13 = vector.load %arg3[%12, %c0_6] : memref<304x128xf32, #tpu.memory_space<vmem>>, vector<1x128xf32>
      tpu.vector_store %arg3[%12, %c0_6], %11 {strides = array<i32>} : memref<304x128xf32, #tpu.memory_space<vmem>>, vector<1x128xf32>,
    }
    %c304_i32_3 = arith.constant 304 : i32
    return
  }
  func.func @transform_1(%arg0: i32, %arg1: memref<304xi32, #tpu.memory_space<smem>>) -> (i32, i32) {
    %c0_i32 = arith.constant 0 : i32
    %c0_i32_0 = arith.constant 0 : i32
    return %arg0, %c0_i32 : i32, i32
  }
}

</mosaic_0001>

<bundles_post_ra>
// kernel: tpu_custom_call.1
= control target key start
LH: loop header
LB: loop body
LE: loop exit
PB: predicated region body
PF: predicated region fallthrough
CT: control target
= control target key end

     0   :  { %s213_s0 = inlined_call_operand.hbm [shape: s32[304], index: 0, kind: input, shape index: {}]   ;;  %s214_s1 = inlined_call_operand.hbm [shape: f32[64,128], index: 1, kind: input, shape index: {}]   ;;  %s215_s2 = inlined_call_operand.hbm [shape: f32[304,128], index: 2, kind: output, shape index: {}]  }
   0x1   :  { %s86_s11 = scalar_lea.hbm %s213_s0, 48  ;;  %s88_s16 = scalar_lea.hbm %s213_s0, 64 }
   0x2   :  { %p87_p0 = scmp.ne.s32.totalorder %s213_s0, %s86_s11  ;;  %p89_p1 = scmp.lt.u32.totalorder %s88_s16, %s86_s11 }
   0x3   :  { %p90_p2 = scmp.lt.u32.totalorder %s86_s11, %s213_s0 }
   0x5   :  { %p91_p3 = por %p90_p2, %p89_p1 }
   0x7   :  { %p92_p4 = pnand %p91_p3, %p87_p0 }
   0x9   :  { %95 = shalt.err (!%p92_p4)  }
   0xa   :  { %s154_s19 = smov [#allocation5]  }
   0xb   :  { %8 = dma.hbm_to_smem %s213_s0, 48, %s154_s19, [#allocation4] }
   0xc   :  { %144 = dma.done.wait [#allocation4], 48 }
   0xd   :  { %145 = vsyncadd [#allocation4], 4294967248 }
   0xe   :  { %10 = sfence }
   0xf   :  { %11 = vsyncpa [#allocation7], 0  ;;  %s155_s22 = smov [#allocation2]   ;;  %s96_s26 = scalar_lea.hbm %s214_s1, 1024 }
  0x10   :  { %s23_s23 = sshll.u32 %s155_s22, 4  ;;  %p97_p5 = scmp.ne.s32.totalorder %s214_s1, %s96_s26  ;;  %s24_s23 = int_to_ptr.vmem [resolvable:$true] %s23_s23 }
  0x11   :  { %p100_p6 = scmp.lt.u32.totalorder %s96_s26, %s214_s1 }
  0x13   :  { %p102_p7 = pnand %p100_p6, %p97_p5 }
  0x15   :  { %105 = shalt.err (!%p102_p7)  }
  0x16   :  { %s106_s0 = scalar_lea.vmem %s24_s23, 1024  ;;  %p111_p9 = scmp.lt.s32.totalorder %s24_s23, %s24_s23 }
  0x17   :  { %p107_p8 = scmp.ne.s32.totalorder %s24_s23, %s106_s0  ;;  %p112_p10 = scmp.lt.s32.totalorder %s106_s0, %s106_s0 }
  0x19   :  { %p113_p11 = por %p112_p10, %p111_p9 }
  0x1b   :  { %p114_p12 = pnand %p113_p11, %p107_p8 }
  0x1d   :  { %117 = shalt.err (!%p114_p12)  }
  0x1e   :  { %26 = dma.hbm_to_vmem [thread:$0]  %s214_s1, 1024, %s24_s23, [#allocation3] }
  0x1f   :  { %146 = dma.done.wait [#allocation3], 1024 }
  0x20   :  { %147 = vsyncadd [#allocation3], 4294966272  ;;  %s150_s5 = smov 0  }
  0x21 LB: > { %s38_s6 = sld [smem:[#allocation5 + %s152_s5]]  ;;  %s41_s8 = scalar_lea.vmem [#allocation6], %s152_s5  ;;  %s152_s5 = sphi %s150_s5, %s36_s5  }
  0x22   : > { %s36_s5 = sadd.s32 1, %s152_s5  }
  0x23   : > { %p33_p13 = scmp.ge.s32.totalorder %s36_s5, 304  }
  0x24   :  { %s156_s9 = smov (%p33_p13), [#allocation6]  }
  0x25   :  { %35 = sbr.rel (!%p33_p13) target bundleno = 33 (0x21), region = 37  ;;  %s48_s10 = sshll.u32 (%p33_p13), %s156_s9, 4  ;;  %s49_s10 = int_to_ptr.vmem [resolvable:$true] %s48_s10 }
  0x26   :  { %s118_s11 = scalar_lea.vmem (%p33_p13), %s49_s10, 4864  ;;  %p123_p1 = scmp.lt.s32.totalorder (%p33_p13), %s49_s10, %s49_s10 }
  0x27   : > { %s39_s7 = scalar_lea.vmem [#allocation2], %s38_s6  ;;  %p119_p0 = scmp.ne.s32.totalorder (%p33_p13), %s49_s10, %s118_s11 }
  0x28   : > { %v40_v0 = vld [vmem:[%s39_s7] sm:$0x1]  ;;  %p124_p2 = scmp.lt.s32.totalorder (%p33_p13), %s118_s11, %s118_s11 }
  0x29   : > { %42 = vst [vmem:[%s41_s8] sm:$0x1] %v40_v0 }
  0x2a   :  { %p125_p3 = por (%p33_p13), %p124_p2, %p123_p1 }
  0x2c   :  { %p126_p4 = pnand %p125_p3, %p119_p0 }
  0x2e   :  { %129 = shalt.err (!%p126_p4)
}
  0x2f   :  { %s130_s13 = scalar_lea.hbm %s215_s2, 4864 }
  0x30   :  { %p131_p5 = scmp.ne.s32.totalorder %s215_s2, %s130_s13  ;;  %p134_p6 = scmp.lt.u32.totalorder %s130_s13, %s215_s2 }
  0x32   :  { %p136_p7 = pnand %p134_p6, %p131_p5 }
  0x34   :  { %139 = shalt.err (!%p136_p7)
}
  0x35   :  { %s157_s18 = smov 128   ;;  %s158_s19 = smov 8  }
  0x36   :  { %54 = dma.vmem_to_hbm [thread:$0]  %s49_s10, 4864, %s215_s2, [#allocation7], %s157_s18, %s157_s18, %s158_s19  }
  0x37   :  { %148 = dma.done.wait [#allocation7], 4864  }
  0x38   :  { %149 = vsyncadd [#allocation7], 4294962432 }
  0x39   :  { %58 = vsyncpa [#allocation7], 1 }
  0x3a   :  { %59 = vsyncmov [#allocation3] }
  0x3d   :  { %s60_s22 = vpop.sfrf %59 }
  0x3e   :  { %p72_p8 = scmp.ne.s32.totalorder %s60_s22, 0 }
  0x40   :  { %64 = shalt.err (%p72_p8)  }

</bundles_post_ra>
